<compile_context>
chip_gen: v5e
topology: v5e:2x2
jax: 0.10.0
libtpu: 0.0.40
codegen_flags: <defaults>
</compile_context>

<pallas_src>
import functools

import jax
import jax.numpy as jnp
from jax import lax
from jax.experimental import pallas as pl
from jax.experimental.pallas import tpu as pltpu

EPS = 1e-5
_LANE = 128
_MAX_BATCH_PER_TILE = 16  # cap on the static per-batch store unroll inside the kernels


def _round_up(x, m):
    return ((x + m - 1) // m) * m


def _vmem_capacity_bytes():
    try:
        return int(pltpu.get_tpu_info().vmem_capacity_bytes)
    except Exception:
        return 64 * 1024 * 1024  # conservative fallback: v7x per-TensorCore VMEM


def _plan_tiles(N, P, C2, Cout, itemsize, vmem_limit, max_cells_override=None):
    """Pick (batches-per-tile, lanes-per-tile) from the VMEM budget.

    Returns (TNB, TPL, GPB, Nb, Ppad, G):
      TNB  batch elements per tile, TPL lanes per tile per batch element,
      GPB  lane-tiles per batch element, Nb/Ppad padded batch / padded lanes,
      G    total number of flat tiles (grid size before the stat-shard split).
    """
    Pp = _round_up(P, _LANE)
    if max_cells_override is None:
        budget = int(vmem_limit * 0.4)
        # Per flat lane ("cell"): input + output blocks, double-buffered, plus the
        # in-kernel f32 temporaries of the (Cout, LT) matmul result.
        per_cell = itemsize * (2 * C2 + 2 * Cout) + 8 * Cout
        max_cells = max(budget // per_cell, _LANE)
    else:
        max_cells = max(int(max_cells_override), _LANE)
    max_cells = (max_cells // _LANE) * _LANE

    if Pp > max_cells:
        # One batch element per tile, several lane-tiles per batch element.
        TNB = 1
        GPB = pl.cdiv(Pp, max_cells)
        TPL = _round_up(pl.cdiv(Pp, GPB), _LANE)
        Ppad = GPB * TPL
        Nb = N
    else:
        # Whole (padded) spatial extent per tile, several batch elements per tile.
        TPL = Pp
        Ppad = Pp
        GPB = 1
        TNB = min(N, max_cells // Pp, _MAX_BATCH_PER_TILE)
        GN = pl.cdiv(N, TNB)
        TNB = pl.cdiv(N, GN)
        Nb = GN * TNB
    G = (Nb // TNB) * GPB
    return TNB, TPL, GPB, Nb, Ppad, G


def _stats_kernel(xs_ref, w_ref, sum_ref, sq_ref):
    """Pass 1: per-channel sum / sum-of-squares of y = Wcat @ xs (per stat shard)."""
    @pl.when(pl.program_id(1) == 0)
    def _init():
        sum_ref[...] = jnp.zeros_like(sum_ref)
        sq_ref[...] = jnp.zeros_like(sq_ref)

    y = jnp.dot(w_ref[...], xs_ref[...], preferred_element_type=jnp.float32)  # (Cout, LT)
    sum_ref[...] += jnp.sum(y, axis=1, keepdims=True)
    sq_ref[...] += jnp.sum(y * y, axis=1, keepdims=True)


def _norm_kernel(xs_ref, ws_ref, shift_ref, out_ref):
    """Pass 2: recompute the fused 1x1 conv with BN scale folded into the weights."""
    y = jnp.dot(ws_ref[...], xs_ref[...], preferred_element_type=jnp.float32)  # (Cout, LT)
    y = y + shift_ref[...]                                                     # (Cout, 1) bcast
    tnb, _, tpl = out_ref.shape
    for bi in range(tnb):  # static unroll, tnb <= _MAX_BATCH_PER_TILE; 128-aligned lane slices
        out_ref[bi] = y[:, bi * tpl:(bi + 1) * tpl].astype(out_ref.dtype)


def _fused_kernel(xs_ref, w_ref, gamma_ref, beta_ref, out_ref, *, count):
    """Single-tile fast path: conv + batch stats + BN in one shot (reads x once)."""
    y = jnp.dot(w_ref[...], xs_ref[...], preferred_element_type=jnp.float32)   # (Cout, L)
    mean = jnp.sum(y, axis=1, keepdims=True) / count
    var = jnp.maximum(jnp.sum(y * y, axis=1, keepdims=True) / count - mean * mean, 0.0)
    scale = gamma_ref[...] * lax.rsqrt(var + EPS)
    shift = beta_ref[...] - mean * scale
    y = y * scale + shift
    tnb, _, tpl = out_ref.shape
    for bi in range(tnb):
        out_ref[bi] = y[:, bi * tpl:(bi + 1) * tpl].astype(out_ref.dtype)


def skip_connection(x, w1, w2, gamma, beta, stride, *, compute_dtype=None,
                    stat_shards=2, _max_cells=None):
    """x: (N, Cin, H, W) NCHW.  w1, w2: (Cout//2, Cin, 1, 1).  Returns (N, Cout, Ho, Wo)."""
    N, Cin, H, W = x.shape
    Co2 = w1.shape[0]
    Cout = 2 * Co2
    C2 = 2 * Cin
    dt = compute_dtype if compute_dtype is not None else x.dtype

    # AvgPool2d(kernel=1, stride) == strided subsample.  The shifted branch is
    # x[:, :, 1::s, 1::s] zero-padded at the tail (no full-size padded copy of x).
    a = x[:, :, ::stride, ::stride]
    Ho, Wo = a.shape[2], a.shape[3]
    b = x[:, :, 1::stride, 1::stride]
    b = jnp.pad(b, ((0, 0), (0, 0), (0, Ho - b.shape[2]), (0, Wo - b.shape[3])))
    P = Ho * Wo

    # One stacked channels-first stream: [relu(a); b] on the channel (sublane) axis,
    # batch+spatial flattened on the lane axis.  ReLU fuses into this copy.
    xs = jnp.concatenate([jnp.maximum(a, 0.0), b], axis=1)          # (N, 2Cin, Ho, Wo)
    xs = jnp.transpose(xs, (1, 0, 2, 3)).reshape(C2, N, P).astype(dt)

    # Block-diagonal fused weight: Wcat @ [relu(a); b] == cat([W1@relu(a), W2@b], channel).
    w1m = w1.reshape(Co2, Cin).astype(jnp.float32)
    w2m = w2.reshape(Co2, Cin).astype(jnp.float32)
    z = jnp.zeros((Co2, Cin), jnp.float32)
    wcat = jnp.concatenate([jnp.concatenate([w1m, z], axis=1),
                            jnp.concatenate([z, w2m], axis=1)], axis=0)  # (Cout, 2Cin)

    itemsize = jnp.dtype(dt).itemsize
    vmem = _vmem_capacity_bytes()
    vlimit = min(int(vmem * 0.75), 100 * 1024 * 1024)
    TNB, TPL, GPB, Nb, Ppad, G = _plan_tiles(N, P, C2, Cout, itemsize, vlimit, _max_cells)

    # Zero-pad lanes (P -> Ppad) and batch (N -> Nb): zeros contribute nothing to the
    # statistics (count stays N*P) and padded outputs are sliced off below.
    xs = jnp.pad(xs, ((0, 0), (0, Nb - N), (0, Ppad - P))).reshape(C2, Nb * Ppad)

    LT = TNB * TPL
    count = float(N * P)
    gamma_c = gamma.reshape(Cout, 1).astype(jnp.float32)
    beta_c = beta.reshape(Cout, 1).astype(jnp.float32)

    if G == 1:
        # Whole problem in a single tile: conv + stats + BN fused in one kernel.
        out = pl.pallas_call(
            functools.partial(_fused_kernel, count=count),
            out_shape=jax.ShapeDtypeStruct((Nb, Cout, Ppad), x.dtype),
            grid=(1,),
            in_specs=[pl.BlockSpec((C2, LT), lambda i: (0, 0)),
                      pl.BlockSpec((Cout, C2), lambda i: (0, 0)),
                      pl.BlockSpec((Cout, 1), lambda i: (0, 0)),
                      pl.BlockSpec((Cout, 1), lambda i: (0, 0))],
            out_specs=pl.BlockSpec((TNB, Cout, TPL), lambda i: (0, 0, 0)),
            compiler_params=pltpu.CompilerParams(vmem_limit_bytes=vlimit),
        )(xs, wcat.astype(dt), gamma_c, beta_c)
    else:
        # Split the flat tile axis into (stat shards, tiles-per-shard); the shard axis
        # is "parallel" (megacore on v7x) with per-shard partial stats merged below.
        SH = stat_shards if (stat_shards > 1 and G % stat_shards == 0) else 1
        G1 = G // SH

        def _xs_map(i0, i1):
            return (0, i0 * G1 + i1)

        def _out_map(i0, i1):
            g = i0 * G1 + i1
            return (g // GPB, 0, g % GPB)

        xs_spec = pl.BlockSpec((C2, LT), _xs_map)
        w_spec = pl.BlockSpec((Cout, C2), lambda i0, i1: (0, 0))
        vec_spec = pl.BlockSpec((Cout, 1), lambda i0, i1: (0, 0))
        stat_spec = pl.BlockSpec((None, Cout, 1), lambda i0, i1: (i0, 0, 0))

        # ---- pass 1: per-channel sum / sum-of-squares (per-shard partials, f32) ----
        ysum, ysq = pl.pallas_call(
            _stats_kernel,
            out_shape=(jax.ShapeDtypeStruct((SH, Cout, 1), jnp.float32),
                       jax.ShapeDtypeStruct((SH, Cout, 1), jnp.float32)),
            grid=(SH, G1),
            in_specs=[xs_spec, w_spec],
            out_specs=(stat_spec, stat_spec),
            compiler_params=pltpu.CompilerParams(
                dimension_semantics=("parallel", "arbitrary"),
                vmem_limit_bytes=vlimit),
        )(xs, wcat.astype(dt))
        ysum = jnp.sum(ysum, axis=0)   # (Cout, 1)
        ysq = jnp.sum(ysq, axis=0)

        # Fold BN (training-mode batch stats, biased variance) into scale/shift; the
        # scale is further folded into the pass-2 weights (one less vector stream).
        mean = ysum / count
        var = jnp.maximum(ysq / count - mean * mean, 0.0)
        scale = gamma_c * lax.rsqrt(var + EPS)
        shift = beta_c - mean * scale
        ws = (wcat * scale).astype(dt)                       # (Cout, 2Cin)

        # ---- pass 2: recompute the tiny fused 1x1 conv, add shift (fully parallel) ----
        out = pl.pallas_call(
            _norm_kernel,
            out_shape=jax.ShapeDtypeStruct((Nb, Cout, Ppad), x.dtype),
            grid=(SH, G1),
            in_specs=[xs_spec, w_spec, vec_spec],
            out_specs=pl.BlockSpec((TNB, Cout, TPL), _out_map),
            compiler_params=pltpu.CompilerParams(
                dimension_semantics=("parallel", "parallel"),
                vmem_limit_bytes=vlimit),
        )(xs, ws, shift)

    return out[:N, :, :P].reshape(N, Cout, Ho, Wo)


def reference(x, w1, w2, gamma, beta, stride):
    """Pure-JAX reference mirroring the PyTorch forward (NCHW)."""
    N, C, H, W = x.shape
    Co2 = w1.shape[0]
    Cout = 2 * Co2
    a = jnp.maximum(x, 0.0)[:, :, ::stride, ::stride]
    shifted = jnp.pad(x[:, :, 1:, 1:], ((0, 0), (0, 0), (0, 1), (0, 1)))
    b = shifted[:, :, ::stride, ::stride]
    y1 = jnp.einsum('nchw,oc->nohw', a, w1.reshape(Co2, C))
    y2 = jnp.einsum('nchw,oc->nohw', b, w2.reshape(Co2, C))
    y = jnp.concatenate([y1, y2], axis=1)
    mean = jnp.mean(y, axis=(0, 2, 3), keepdims=True)
    var = jnp.mean((y - mean) ** 2, axis=(0, 2, 3), keepdims=True)
    return ((y - mean) * lax.rsqrt(var + EPS) * gamma.reshape(1, Cout, 1, 1)
            + beta.reshape(1, Cout, 1, 1))


if __name__ == "__main__":
    def make_case(key, N, Cin, Cout, H, W):
        kx, k1, k2, kg, kb = jax.random.split(key, 5)
        Co2 = Cout // 2
        x = jax.random.normal(kx, (N, Cin, H, W), dtype=jnp.float32)
        w1 = jax.random.normal(k1, (Co2, Cin, 1, 1), dtype=jnp.float32) * 0.5
        w2 = jax.random.normal(k2, (Co2, Cin, 1, 1), dtype=jnp.float32) * 0.5
        g = 1.0 + 0.1 * jax.random.normal(kg, (Cout,), dtype=jnp.float32)
        b = 0.1 * jax.random.normal(kb, (Cout,), dtype=jnp.float32)
        return x, w1, w2, g, b

    k0, k1, k2 = jax.random.split(jax.random.PRNGKey(0), 3)

    # Primary case (small shapes implied by the module): single-tile fused path.
    x, w1, w2, g, b = make_case(k0, 2, 4, 8, 16, 16)
    out = jax.block_until_ready(skip_connection(x, w1, w2, g, b, 2))
    ref = reference(x, w1, w2, g, b, 2)
    assert out.shape == ref.shape, (out.shape, ref.shape)
    assert jnp.allclose(out, ref, atol=1e-4, rtol=1e-4), "mismatch vs reference (fused path)"

    # Two-pass tiled path: lane-tiling within a batch element (GPB > 1) + 2 stat shards.
    x, w1, w2, g, b = make_case(k1, 3, 4, 8, 32, 32)
    out = jax.block_until_ready(skip_connection(x, w1, w2, g, b, 1, _max_cells=256))
    ref = reference(x, w1, w2, g, b, 1)
    assert jnp.allclose(out, ref, atol=1e-3, rtol=1e-3), "mismatch vs reference (GPB>1 path)"

    # Two-pass tiled path: several batch elements per tile (TNB > 1) + batch/lane padding.
    x, w1, w2, g, b = make_case(k2, 3, 4, 8, 8, 8)
    out = jax.block_until_ready(skip_connection(x, w1, w2, g, b, 1, _max_cells=256))
    ref = reference(x, w1, w2, g, b, 1)
    assert jnp.allclose(out, ref, atol=1e-3, rtol=1e-3), "mismatch vs reference (TNB>1 path)"

    print("KERNEL_OK")
</pallas_src>

<mosaic_0001>
module attributes {stable_mosaic.version = 11 : i64} {
  func.func @_fused_kernel(%arg0: i32, %arg1: memref<8x256xf32, #tpu.memory_space<vmem>>, %arg2: memref<8x8xf32, #tpu.memory_space<vmem>>, %arg3: memref<8x1xf32, #tpu.memory_space<vmem>>, %arg4: memref<8x1xf32, #tpu.memory_space<vmem>>, %arg5: memref<2x8x128xf32, #tpu.memory_space<vmem>>) attributes {dimension_semantics = [#tpu.dimension_semantics<arbitrary>], iteration_bounds = array<i64: 1>, scalar_prefetch = 0 : i64, scratch_operands = 0 : i64, tpu.core_type = #tpu.core_type<tc>, window_params = [{pipeline_mode = #tpu.pipeline_mode<synchronous>, transform_indices = @transform_0, window_bounds = array<i64: 8, 256>}, {pipeline_mode = #tpu.pipeline_mode<synchronous>, transform_indices = @transform_1, window_bounds = array<i64: 8, 8>}, {pipeline_mode = #tpu.pipeline_mode<synchronous>, transform_indices = @transform_2, window_bounds = array<i64: 8, 1>}, {pipeline_mode = #tpu.pipeline_mode<synchronous>, transform_indices = @transform_3, window_bounds = array<i64: 8, 1>}, {pipeline_mode = #tpu.pipeline_mode<synchronous>, transform_indices = @transform_4, window_bounds = array<i64: 2, 8, 128>}]} {
    %c0 = arith.constant 0 : index
    %c0_0 = arith.constant 0 : index
    %0 = vector.load %arg2[%c0, %c0_0] : memref<8x8xf32, #tpu.memory_space<vmem>>, vector<8x8xf32>
    %c0_1 = arith.constant 0 : index
    %c0_2 = arith.constant 0 : index
    %1 = vector.load %arg1[%c0_1, %c0_2] : memref<8x256xf32, #tpu.memory_space<vmem>>, vector<8x256xf32>
    %cst = arith.constant dense<0.000000e+00> : vector<8x256xf32>
    %2 = tpu.matmul %0, %1, %cst {dimension_numbers = #tpu.dot_dimension_numbers<[1], [0], [0], [1], [0, 0, 1, 1], [], []>} : vector<8x8xf32>, vector<8x256xf32>, vector<8x256xf32> -> vector<8x256xf32>
    %cst_3 = arith.constant dense<0.000000e+00> : vector<8xf32>
    %3 = vector.multi_reduction <add>, %2, %cst_3 [1] : vector<8x256xf32> to vector<8xf32>
    %4 = vector.shape_cast %3 : vector<8xf32> to vector<8x1xf32>
    %cst_4 = arith.constant 1.280000e+02 : f32
    %5 = vector.broadcast %cst_4 : f32 to vector<8x1xf32>
    %6 = arith.divf %4, %5 : vector<8x1xf32>
    %7 = arith.mulf %2, %2 : vector<8x256xf32>
    %cst_5 = arith.constant dense<0.000000e+00> : vector<8xf32>
    %8 = vector.multi_reduction <add>, %7, %cst_5 [1] : vector<8x256xf32> to vector<8xf32>
    %9 = vector.shape_cast %8 : vector<8xf32> to vector<8x1xf32>
    %cst_6 = arith.constant 1.280000e+02 : f32
    %10 = vector.broadcast %cst_6 : f32 to vector<8x1xf32>
    %11 = arith.divf %9, %10 : vector<8x1xf32>
    %12 = arith.mulf %6, %6 : vector<8x1xf32>
    %13 = arith.subf %11, %12 : vector<8x1xf32>
    %cst_7 = arith.constant 0.000000e+00 : f32
    %14 = vector.broadcast %cst_7 : f32 to vector<8x1xf32>
    %15 = arith.maximumf %13, %14 : vector<8x1xf32>
    %c0_8 = arith.constant 0 : index
    %c0_9 = arith.constant 0 : index
    %16 = vector.load %arg3[%c0_8, %c0_9] : memref<8x1xf32, #tpu.memory_space<vmem>>, vector<8x1xf32>
    %cst_10 = arith.constant 9.99999974E-6 : f32
    %17 = vector.broadcast %cst_10 : f32 to vector<8x1xf32>
    %18 = arith.addf %15, %17 : vector<8x1xf32>
    %19 = math.rsqrt %18 : vector<8x1xf32>
    %20 = arith.mulf %16, %19 : vector<8x1xf32>
    %c0_11 = arith.constant 0 : index
    %c0_12 = arith.constant 0 : index
    %21 = vector.load %arg4[%c0_11, %c0_12] : memref<8x1xf32, #tpu.memory_space<vmem>>, vector<8x1xf32>
    %22 = arith.mulf %6, %20 : vector<8x1xf32>
    %23 = arith.subf %21, %22 : vector<8x1xf32>
    %24 = vector.broadcast %20 : vector<8x1xf32> to vector<8x256xf32>
    %25 = arith.mulf %2, %24 : vector<8x256xf32>
    %26 = vector.broadcast %23 : vector<8x1xf32> to vector<8x256xf32>
    %27 = arith.addf %25, %26 : vector<8x256xf32>
    %28 = vector.extract_strided_slice %27 {offsets = [0, 0], sizes = [8, 128], strides = [1, 1]} : vector<8x256xf32> to vector<8x128xf32>
    %c0_13 = arith.constant 0 : index
    %c0_14 = arith.constant 0 : index
    %c0_15 = arith.constant 0 : index
    %29 = vector.load %arg5[%c0_13, %c0_14, %c0_15] : memref<2x8x128xf32, #tpu.memory_space<vmem>>, vector<1x8x128xf32>
    %30 = vector.shape_cast %29 : vector<1x8x128xf32> to vector<8x128xf32>
    %31 = vector.shape_cast %28 : vector<8x128xf32> to vector<1x8x128xf32>
    tpu.vector_store %arg5[%c0_13, %c0_14, %c0_15], %31 {strides = array<i32>} : memref<2x8x128xf32, #tpu.memory_space<vmem>>, vector<1x8x128xf32>,
    %32 = vector.extract_strided_slice %27 {offsets = [0, 128], sizes = [8, 128], strides = [1, 1]} : vector<8x256xf32> to vector<8x128xf32>
    %c1 = arith.constant 1 : index
    %c0_16 = arith.constant 0 : index
    %c0_17 = arith.constant 0 : index
    %33 = vector.load %arg5[%c1, %c0_16, %c0_17] : memref<2x8x128xf32, #tpu.memory_space<vmem>>, vector<1x8x128xf32>
    %34 = vector.shape_cast %33 : vector<1x8x128xf32> to vector<8x128xf32>
    %35 = vector.shape_cast %32 : vector<8x128xf32> to vector<1x8x128xf32>
    tpu.vector_store %arg5[%c1, %c0_16, %c0_17], %35 {strides = array<i32>} : memref<2x8x128xf32, #tpu.memory_space<vmem>>, vector<1x8x128xf32>,
    return
  }
  func.func @transform_0(%arg0: i32) -> (i32, i32) {
    %c0_i32 = arith.constant 0 : i32
    %c0_i32_0 = arith.constant 0 : i32
    %c0_i32_1 = arith.constant 0 : i32
    return %c0_i32, %c0_i32_0 : i32, i32
  }
  func.func @transform_1(%arg0: i32) -> (i32, i32) {
    %c0_i32 = arith.constant 0 : i32
    %c0_i32_0 = arith.constant 0 : i32
    %c0_i32_1 = arith.constant 0 : i32
    return %c0_i32, %c0_i32_0 : i32, i32
  }
  func.func @transform_2(%arg0: i32) -> (i32, i32) {
    %c0_i32 = arith.constant 0 : i32
    %c0_i32_0 = arith.constant 0 : i32
    %c0_i32_1 = arith.constant 0 : i32
    return %c0_i32, %c0_i32_0 : i32, i32
  }
  func.func @transform_3(%arg0: i32) -> (i32, i32) {
    %c0_i32 = arith.constant 0 : i32
    %c0_i32_0 = arith.constant 0 : i32
    %c0_i32_1 = arith.constant 0 : i32
    return %c0_i32, %c0_i32_0 : i32, i32
  }
  func.func @transform_4(%arg0: i32) -> (i32, i32, i32) {
    %c0_i32 = arith.constant 0 : i32
    %c0_i32_0 = arith.constant 0 : i32
    %c0_i32_1 = arith.constant 0 : i32
    %c0_i32_2 = arith.constant 0 : i32
    return %c0_i32, %c0_i32_0, %c0_i32_1 : i32, i32, i32
  }
}

</mosaic_0001>

<bundles_post_ra>
// kernel: tpu_custom_call.1
= control target key start
LH: loop header
LB: loop body
LE: loop exit
PB: predicated region body
PF: predicated region fallthrough
CT: control target
= control target key end

     0   :  { %9 = vsyncpa [#allocation3], 0  ;;  %s266_s0 = inlined_call_operand.vmem [shape: f32[8,256], index: 0, kind: input, shape index: {}]   ;;  %s267_s1 = inlined_call_operand.hbm [shape: f32[8,8], index: 1, kind: input, shape index: {}]   ;;  %s268_s2 = inlined_call_operand.vmem [shape: f32[8,1], index: 2, kind: input, shape index: {}]   ;;  %s269_s3 = inlined_call_operand.vmem [shape: f32[8,1], index: 3, kind: input, shape index: {}]   ;;  %s270_s4 = inlined_call_operand.hbm [shape: f32[2,8,128], index: 4, kind: output, shape index: {}]  }
   0x1   :  { %10 = vsyncpa [#allocation4], 0  ;;  %s18_s17 = sshll.u32 %s267_s1, 4  ;;  %s217_s18 = smov [#allocation2]   ;;  %s19_s17 = int_to_ptr.hbm [resolvable:$true] %s18_s17 }
   0x2   :  { %s20_s19 = sshll.u32 %s217_s18, 4  ;;  %s21_s19 = int_to_ptr.vmem [resolvable:$true] %s20_s19 }
   0x3   :  { %23 = dma.hbm_to_vmem [thread:$0]  %s19_s17, 128, %s21_s19, [#allocation3]  }
   0x4   :  { %213 = dma.done.wait [#allocation3], 128  }
   0x5   :  { %214 = vsyncadd [#allocation3], 4294967168  ;;  %vm35_vm0 = vcmask 64512   ;;  %v33_v0 = vld [vmem:[%s266_s0] sm:$0xff]  ;;  %v34_v1 = vld [vmem:[%s266_s0 + $0x8] sm:$0xff]  ;;  %v218_v9 = vmov 128.0  }
   0x6   :  { %v32_v2 = vld [vmem:[#allocation2] sm:$0xff]  ;;  %54 = vmatpush.msra.mxu0 %v33_v0  ;;  %74 = vmatpush.msra.mxu1 %v34_v1  ;;  %161 = vrcp.f32 %v218_v9  ;;  %v219_v13 = vmov 0   ;;  %s220_s26 = smov [#allocation5]   ;;  %s221_s30 = smov 128  }
   0x7   :  { %151 = vmatmul.msk.f32.vlgmr.msra.gmra.mxu0 %vm35_vm0, %v32_v2  ;;  %152 = vmatmul.msk.f32.vlgmr.msra.gmra.mxu1 %vm35_vm0, %v32_v2  ;;  %v99_v30 = vld [vmem:[%s268_s2] sm:$0xff]  ;;  %s136_s27 = sshll.u32 %s220_s26, 4  ;;  %s138_s2 = sshll.u32 %s270_s4, 4  ;;  %s137_s27 = int_to_ptr.vmem [resolvable:$true] %s136_s27  ;;  %s139_s2 = int_to_ptr.hbm [resolvable:$true] %s138_s2 }
   0x8   :  { %159 = vset.pattern.permute.xlu1 %v219_v13  ;;  %160 = vset.pattern.permute.xlu0 %v219_v13  ;;  %v112_v35 = vld [vmem:[%s269_s3] sm:$0xff]  ;;  %s222_s3 = smov 8  }
   0xc   :  { %v162_v10 = vpop.eup %161 }
   0xd   :  { %v83_v11 = vmul.f32 128.0, %v162_v10  ;;  %vm87_vm1 = vweird.f32 %v162_v10 }
   0xf   :  { %v84_v12 = vsub.f32 1.0, %v83_v11 }
  0x11   :  { %v85_v14 = vmul.f32 %v162_v10, %v84_v12 }
  0x13   :  { %v86_v15 = vadd.f32 %v162_v10, %v85_v14 }
  0x15   :  { %v88_v17 = vsel %vm87_vm1, %v162_v10, %v86_v15 }
  0x84   :  { %v56_v3 = vpop.f32.mrf.mxu0  ;;  %v76_v4 = vpop.f32.mrf.mxu1 }
  0x85   :  { %v79_v5 = vadd.f32 %v76_v4, %v56_v3  ;;  %v90_v6 = vmul.f32 %v56_v3, %v56_v3  ;;  %v91_v7 = vmul.f32 %v76_v4, %v76_v4 }
  0x87   :  { %80 = vadd.xlane.f32.xlu0 %v79_v5  ;;  %v92_v8 = vadd.f32 %v91_v7, %v90_v6 }
  0x8f   :  { %93 = vadd.xlane.f32.xlu0 %v92_v8 }
  0xfa   :  { %v81_v16 = vpop.xlane.xlu0 %80 }
  0xfb   :  { %v89_v18 = vmul.f32 %v88_v17, %v81_v16 }
  0xfd   :  { %v96_v20 = vmul.f32 %v89_v18, %v89_v18 }
 0x102   :  { %v94_v19 = vpop.xlane.xlu0 %93 }
 0x103   :  { %v95_v21 = vmul.f32 %v94_v19, %v88_v17 }
 0x105   :  { %v97_v22 = vsub.f32 %v95_v21, %v96_v20 }
 0x107   :  { %v98_v23 = vmax.f32 %v97_v22, 0.0 }
 0x109   :  { %v100_v24 = vadd.f32 1e-05, %v98_v23 }
 0x10b   :  { %163 = vrsqrt.f32 %v100_v24  ;;  %vm107_vm3 = vweird.f32 %v100_v24 }
 0x111   :  { %v164_v25 = vpop.eup %163 }
 0x112   :  { %v102_v26 = vmul.f32 %v164_v25, %v100_v24  ;;  %vm108_vm2 = vweird.f32 %v164_v25 }
 0x113   :  { %vm109_vm4 = vmor %vm107_vm3, %vm108_vm2 }
 0x114   :  { %v103_v27 = vmul.f32 %v164_v25, %v102_v26 }
 0x116   :  { %v104_v28 = vmul.f32 0.5, %v103_v27 }
 0x118   :  { %v105_v29 = vsub.f32 1.5, %v104_v28 }
 0x11a   :  { %v106_v31 = vmul.f32 %v164_v25, %v105_v29 }
 0x11c   :  { %v110_v32 = vsel %vm109_vm4, %v164_v25, %v106_v31 }
 0x11d   :  { %v111_v33 = vmul.f32 %v110_v32, %v99_v30 }
 0x11f   :  { %117 = vperm.xlu1 %159, %v111_v33   ;;  %v113_v34 = vmul.f32 %v111_v33, %v89_v18 }
 0x121   :  { %v114_v36 = vsub.f32 %v112_v35, %v113_v34 }
 0x127   :  { %124 = vperm.xlu1 %159, %v114_v36  }
 0x191   :  { %v118_v37 = vpop.permute.xlu1 %117 }
 0x192   :  { %v120_v38 = vmul.f32 %v118_v37, %v56_v3  ;;  %v121_v39 = vmul.f32 %v118_v37, %v76_v4 }
 0x199   :  { %v125_v40 = vpop.permute.xlu1 %124 }
 0x19a   :  { %v127_v41 = vadd.f32 %v125_v40, %v120_v38  ;;  %v128_v42 = vadd.f32 %v125_v40, %v121_v39 }
 0x19c   :  { %129 = vst [vmem:[#allocation5] sm:$0xff] %v127_v41 }
 0x19d   :  { %131 = vst [vmem:[#allocation5 + $0x8] sm:$0xff] %v128_v42 }
 0x19e   :  { %144 = dma.vmem_to_hbm [thread:$0]  %s137_s27, 256, %s139_s2, [#allocation4], %s221_s30, %s221_s30, %s222_s3  }
 0x19f   :  { %215 = dma.done.wait [#allocation4], 256  }
 0x1a0   :  { %216 = vsyncadd [#allocation4], 4294967040 }
 0x1a1   :  { %149 = vsyncpa [#allocation3], 1 }
 0x1a2   :  { %150 = vsyncpa [#allocation4], 1 }

</bundles_post_ra>
